<compile_context>
chip_gen: v7x
topology: tpu7x:2x2x1
jax: 0.10.0
libtpu: 0.0.40
codegen_flags: <defaults>
</compile_context>

<pallas_src>
import jax
import jax.numpy as jnp
from jax.experimental import pallas as pl
from jax.experimental.pallas import tpu as pltpu


EPS = 1e-5          # nn.BatchNorm1d default eps
LANE = 128          # TPU lane width; hidden feature dims are padded to this


def _round_up(n, m):
    return ((n + m - 1) // m) * m


def _pick_batch_tile(batch):
    """Largest batch tile (multiple of 8, <= 512) that divides the batch."""
    for t in (512, 256, 128, 64, 32, 16, 8):
        if batch % t == 0:
            return t
    return batch          # ragged / tiny batch: fall back to a single grid step


def _pick_vmem_limit():
    """~3/4 of physical VMEM: 48 MiB on v7x, 96 MiB on v5e/v6e."""
    try:
        cap = pltpu.get_tpu_info().vmem_capacity_bytes
    except Exception:
        cap = 64 << 20    # conservative fallback (v7x-sized)
    return int(min(96 << 20, (cap * 3) // 4))


def actor_kernel(x_ref, w1_ref, w2_ref, w4_ref, pp_ref, b4_ref, o_ref,
                 sum_ref, ssq_ref, h1_ref):
    """Phase 1 (every grid step, pipelined over batch tiles):
           fc1 on the current x tile (bf16 MXU, f32 accum) + BN1 sum / sumsq.
       Phase 2 (last grid step, full batch resident in VMEM):
           BN1 apply + ReLU -> fc2 -> BN2 + ReLU -> fc4 + bias -> tanh -> store.
    """
    i = pl.program_id(0)
    num_tiles = pl.num_programs(0)
    tb = x_ref.shape[0]

    @pl.when(i == 0)
    def _init():
        sum_ref[...] = jnp.zeros_like(sum_ref)
        ssq_ref[...] = jnp.zeros_like(ssq_ref)

    # ---- Phase 1: fc1 tile + BN1 statistics (single pass, no `centered`). ----
    # fc1 bias is omitted: it is cancelled exactly by the BN mean subtraction.
    h1t = jnp.dot(x_ref[...].astype(jnp.bfloat16), w1_ref[...],
                  preferred_element_type=jnp.float32)
    sum_ref[...] += jnp.sum(h1t, axis=0, keepdims=True)
    ssq_ref[...] += jnp.sum(h1t * h1t, axis=0, keepdims=True)

    off = i * tb
    if tb % 8 == 0:
        off = pl.multiple_of(off, 8)
    h1_ref[pl.ds(off, tb), :] = h1t

    # ---- Phase 2: rest of the network over the full batch (last step). ----
    @pl.when(i == num_tiles - 1)
    def _tail():
        pp = pp_ref[...]                        # one (8, 128) vreg load
        g1, be1 = pp[0:1, :], pp[1:2, :]
        g2, be2 = pp[2:3, :], pp[3:4, :]

        batch = h1_ref.shape[0]
        inv_n = 1.0 / batch

        # BN1 folded to scale/shift; var = E[h^2] - mean^2 (f32, clamped).
        mean1 = sum_ref[...] * inv_n
        var1 = jnp.maximum(ssq_ref[...] * inv_n - mean1 * mean1, 0.0)
        scale1 = g1 * jax.lax.rsqrt(var1 + EPS)   # padded chans: gamma=0 -> 0
        shift1 = be1 - mean1 * scale1
        h1n = jnp.maximum(h1_ref[...] * scale1 + shift1, 0.0)

        # fc2 (bias cancelled by BN2) -> BN2 -> ReLU.
        h2 = jnp.dot(h1n.astype(jnp.bfloat16), w2_ref[...],
                     preferred_element_type=jnp.float32)
        mean2 = jnp.mean(h2, axis=0, keepdims=True)
        var2 = jnp.maximum(jnp.mean(h2 * h2, axis=0, keepdims=True)
                           - mean2 * mean2, 0.0)
        scale2 = g2 * jax.lax.rsqrt(var2 + EPS)
        shift2 = be2 - mean2 * scale2
        h2n = jnp.maximum(h2 * scale2 + shift2, 0.0)

        # fc4 -> tanh.  w4 / b4 / out keep the true (narrow) output width.
        a = jnp.dot(h2n.astype(jnp.bfloat16), w4_ref[...],
                    preferred_element_type=jnp.float32) + b4_ref[...]
        o_ref[...] = jnp.tanh(a).astype(o_ref.dtype)


def init_actor_params(key, state_dim, hidden_dim, output_dim):
    """PyTorch-equivalent parameters (weights stored (in_features, out_features)).

    - fc1/fc2 weights: uniform(-1/sqrt(fan), 1/sqrt(fan))   (hidden_init)
    - fc4 weights:     uniform(-0.003, 0.003)
    - biases:          PyTorch Linear default uniform(-1/sqrt(in), 1/sqrt(in))
    - BN gamma=1, beta=0 (fresh BatchNorm1d defaults)
    """
    h0, h1 = hidden_dim[0], hidden_dim[1]
    k = jax.random.split(key, 6)

    lim1 = 1.0 / jnp.sqrt(jnp.float32(h0))   # hidden_init uses weight.size()[0]
    w1 = jax.random.uniform(k[0], (state_dim, h0), jnp.float32, -lim1, lim1)
    b1 = jax.random.uniform(
        k[1], (1, h0), jnp.float32,
        -1.0 / jnp.sqrt(jnp.float32(state_dim)), 1.0 / jnp.sqrt(jnp.float32(state_dim)))

    lim2 = 1.0 / jnp.sqrt(jnp.float32(h1))
    w2 = jax.random.uniform(k[2], (h0, h1), jnp.float32, -lim2, lim2)
    b2 = jax.random.uniform(
        k[3], (1, h1), jnp.float32,
        -1.0 / jnp.sqrt(jnp.float32(h0)), 1.0 / jnp.sqrt(jnp.float32(h0)))

    w4 = jax.random.uniform(k[4], (h1, output_dim), jnp.float32, -0.003, 0.003)
    b4 = jax.random.uniform(
        k[5], (1, output_dim), jnp.float32,
        -1.0 / jnp.sqrt(jnp.float32(h1)), 1.0 / jnp.sqrt(jnp.float32(h1)))

    g1 = jnp.ones((1, h0), jnp.float32)
    be1 = jnp.zeros((1, h0), jnp.float32)
    g2 = jnp.ones((1, h1), jnp.float32)
    be2 = jnp.zeros((1, h1), jnp.float32)

    return dict(w1=w1, b1=b1, g1=g1, be1=be1,
                w2=w2, b2=b2, g2=g2, be2=be2,
                w4=w4, b4=b4)


def pack_params_for_kernel(p):
    """bf16 weights, hidden dims zero-padded to 128 lanes; x's feature dim and
    the output dim stay at their true widths (no host pad of x, minimal
    writeback).  BN gamma/beta packed into one vreg-aligned (8, 128) array;
    padded channels keep gamma = beta = 0 so they stay exactly zero."""
    state_dim, h0 = p["w1"].shape
    _, h1 = p["w2"].shape
    _, out_dim = p["w4"].shape

    h0p = _round_up(h0, LANE)
    h1p = _round_up(h1, LANE)

    w1p = jnp.zeros((state_dim, h0p), jnp.bfloat16).at[:, :h0].set(
        p["w1"].astype(jnp.bfloat16))
    w2p = jnp.zeros((h0p, h1p), jnp.bfloat16).at[:h0, :h1].set(
        p["w2"].astype(jnp.bfloat16))
    w4p = jnp.zeros((h1p, out_dim), jnp.bfloat16).at[:h1, :].set(
        p["w4"].astype(jnp.bfloat16))

    pp = jnp.zeros((8, LANE), jnp.float32)
    pp = pp.at[0, :h0].set(p["g1"][0])
    pp = pp.at[1, :h0].set(p["be1"][0])
    pp = pp.at[2, :h1].set(p["g2"][0])
    pp = pp.at[3, :h1].set(p["be2"][0])

    b4 = p["b4"].astype(jnp.float32)          # (1, out_dim), exact in f32
    return (w1p, w2p, w4p, pp, b4), out_dim


def make_actor_forward(params, batch_tile=None):
    (w1p, w2p, w4p, pp, b4), out_dim = pack_params_for_kernel(params)
    state_dim, h0p = w1p.shape
    _, h1p = w2p.shape
    vmem_limit = _pick_vmem_limit()

    @jax.jit
    def fwd(x):
        batch, sdim = x.shape
        assert sdim == state_dim
        tb = batch_tile if batch_tile is not None else _pick_batch_tile(batch)
        if batch % tb != 0:
            tb = batch
        num_tiles = batch // tb

        const = lambda i: (0, 0)
        return pl.pallas_call(
            actor_kernel,
            out_shape=jax.ShapeDtypeStruct((batch, out_dim), jnp.float32),
            grid_spec=pltpu.PrefetchScalarGridSpec(
                num_scalar_prefetch=0,
                grid=(num_tiles,),
                in_specs=[
                    pl.BlockSpec((tb, state_dim), lambda i: (i, 0)),  # x (pipelined)
                    pl.BlockSpec((state_dim, h0p), const),            # w1 (resident)
                    pl.BlockSpec((h0p, h1p), const),                  # w2
                    pl.BlockSpec((h1p, out_dim), const),              # w4
                    pl.BlockSpec((8, LANE), const),                   # packed BN params
                    pl.BlockSpec((1, out_dim), const),                # fc4 bias
                ],
                out_specs=pl.BlockSpec((batch, out_dim), const),      # written last step
                scratch_shapes=[
                    pltpu.VMEM((1, LANE), jnp.float32),    # BN1 column sums
                    pltpu.VMEM((1, LANE), jnp.float32),    # BN1 column sum-of-squares
                    pltpu.VMEM((batch, h0p), jnp.float32), # full-batch h1
                ],
            ),
            compiler_params=pltpu.CompilerParams(
                dimension_semantics=("arbitrary",),  # stats -> apply is sequential
                vmem_limit_bytes=vmem_limit,
            ),
        )(x, w1p, w2p, w4p, pp, b4)

    return fwd


if __name__ == "__main__":
    state_dim = 16
    hidden_dim = (32, 32)
    output_dim = 8
    batch = 32          # 4 batch tiles of 8 -> exercises the pipelined stats phase

    key = jax.random.PRNGKey(0)
    kx, kp = jax.random.split(key)
    x = jax.random.normal(kx, (batch, state_dim), jnp.float32)
    params = init_actor_params(kp, state_dim, hidden_dim, output_dim)

    actor_forward = make_actor_forward(params, batch_tile=8)
    out = actor_forward(x)
    jax.block_until_ready(out)

    # Pure-JAX references (== PyTorch forward in training mode, incl. the fc1/fc2
    # biases that the kernel omits — exact cancellation under BatchNorm).
    def ref(x, cast=None):
        cast = (lambda a: a) if cast is None else cast

        def bn_relu(h, g, b):
            m = jnp.mean(h, axis=0, keepdims=True)
            v = jnp.mean((h - m) ** 2, axis=0, keepdims=True)
            return jnp.maximum((h - m) / jnp.sqrt(v + EPS) * g + b, 0.0)

        dot = lambda a, w: jnp.dot(cast(a), cast(w),
                                   preferred_element_type=jnp.float32)
        h1 = bn_relu(dot(x, params["w1"]) + params["b1"], params["g1"], params["be1"])
        h2 = bn_relu(dot(h1, params["w2"]) + params["b2"], params["g2"], params["be2"])
        return jnp.tanh(dot(h2, params["w4"]) + params["b4"])

    # (a) same-precision reference (bf16 matmul operands, f32 accumulation)
    exp_bf16 = ref(x, cast=lambda a: a.astype(jnp.bfloat16))
    # (b) full-f32 PyTorch-equivalent reference
    exp_f32 = ref(x)

    assert out.shape == (batch, output_dim)
    assert jnp.allclose(out, exp_bf16, atol=2e-4, rtol=1e-3), (
        float(jnp.max(jnp.abs(out - exp_bf16))))
    assert jnp.allclose(out, exp_f32, atol=5e-3, rtol=1e-2), (
        float(jnp.max(jnp.abs(out - exp_f32))))

    print("KERNEL_OK")
</pallas_src>

<mosaic_0001>
module attributes {stable_mosaic.version = 11 : i64} {
  func.func @actor_kernel(%arg0: i32, %arg1: memref<8x16xf32, #tpu.memory_space<vmem>>, %arg2: memref<16x128xbf16, #tpu.memory_space<vmem>>, %arg3: memref<128x128xbf16, #tpu.memory_space<vmem>>, %arg4: memref<128x8xbf16, #tpu.memory_space<vmem>>, %arg5: memref<8x128xf32, #tpu.memory_space<vmem>>, %arg6: memref<1x8xf32, #tpu.memory_space<vmem>>, %arg7: memref<32x8xf32, #tpu.memory_space<vmem>>, %arg8: memref<1x128xf32, #tpu.memory_space<vmem>>, %arg9: memref<1x128xf32, #tpu.memory_space<vmem>>, %arg10: memref<32x128xf32, #tpu.memory_space<vmem>>) attributes {dimension_semantics = [#tpu.dimension_semantics<arbitrary>], iteration_bounds = array<i64: 4>, scalar_prefetch = 0 : i64, scratch_operands = 3 : i64, tpu.core_type = #tpu.core_type<tc>, window_params = [{transform_indices = @transform_0, window_bounds = array<i64: 8, 16>}, {pipeline_mode = #tpu.pipeline_mode<synchronous>, transform_indices = @transform_1, window_bounds = array<i64: 16, 128>}, {pipeline_mode = #tpu.pipeline_mode<synchronous>, transform_indices = @transform_2, window_bounds = array<i64: 128, 128>}, {pipeline_mode = #tpu.pipeline_mode<synchronous>, transform_indices = @transform_3, window_bounds = array<i64: 128, 8>}, {pipeline_mode = #tpu.pipeline_mode<synchronous>, transform_indices = @transform_4, window_bounds = array<i64: 8, 128>}, {pipeline_mode = #tpu.pipeline_mode<synchronous>, transform_indices = @transform_5, window_bounds = array<i64: 1, 8>}, {pipeline_mode = #tpu.pipeline_mode<synchronous>, transform_indices = @transform_6, window_bounds = array<i64: 32, 8>}]} {
    %c0_i32 = arith.constant 0 : i32
    %0 = arith.cmpi eq, %arg0, %c0_i32 : i32
    %1 = arith.extui %0 : i1 to i32
    %c0_i32_0 = arith.constant 0 : i32
    %2 = arith.cmpi ne, %1, %c0_i32_0 : i32
    scf.if %2 {
      %cst_16 = arith.constant 0.000000e+00 : f32
      %25 = vector.broadcast %cst_16 : f32 to vector<1x128xf32>
      %c0_17 = arith.constant 0 : index
      %c0_18 = arith.constant 0 : index
      %26 = vector.load %arg8[%c0_17, %c0_18] : memref<1x128xf32, #tpu.memory_space<vmem>>, vector<1x128xf32>
      tpu.vector_store %arg8[%c0_17, %c0_18], %25 {strides = array<i32>} : memref<1x128xf32, #tpu.memory_space<vmem>>, vector<1x128xf32>,
      %cst_19 = arith.constant 0.000000e+00 : f32
      %27 = vector.broadcast %cst_19 : f32 to vector<1x128xf32>
      %c0_20 = arith.constant 0 : index
      %c0_21 = arith.constant 0 : index
      %28 = vector.load %arg9[%c0_20, %c0_21] : memref<1x128xf32, #tpu.memory_space<vmem>>, vector<1x128xf32>
      tpu.vector_store %arg9[%c0_20, %c0_21], %27 {strides = array<i32>} : memref<1x128xf32, #tpu.memory_space<vmem>>, vector<1x128xf32>,
    } else {
    }
    %c0 = arith.constant 0 : index
    %c0_1 = arith.constant 0 : index
    %3 = vector.load %arg1[%c0, %c0_1] : memref<8x16xf32, #tpu.memory_space<vmem>>, vector<8x16xf32>
    %4 = arith.truncf %3 : vector<8x16xf32> to vector<8x16xbf16>
    %c0_2 = arith.constant 0 : index
    %c0_3 = arith.constant 0 : index
    %5 = vector.load %arg2[%c0_2, %c0_3] : memref<16x128xbf16, #tpu.memory_space<vmem>>, vector<16x128xbf16>
    %cst = arith.constant dense<0.000000e+00> : vector<8x128xf32>
    %6 = tpu.matmul %4, %5, %cst {dimension_numbers = #tpu.dot_dimension_numbers<[1], [0], [0], [1], [0, 0, 1, 1], [], []>} : vector<8x16xbf16>, vector<16x128xbf16>, vector<8x128xf32> -> vector<8x128xf32>
    %c0_4 = arith.constant 0 : index
    %c0_5 = arith.constant 0 : index
    %7 = vector.load %arg8[%c0_4, %c0_5] : memref<1x128xf32, #tpu.memory_space<vmem>>, vector<1x128xf32>
    %cst_6 = arith.constant dense<0.000000e+00> : vector<128xf32>
    %8 = vector.multi_reduction <add>, %6, %cst_6 [0] : vector<8x128xf32> to vector<128xf32>
    %9 = vector.shape_cast %8 : vector<128xf32> to vector<1x128xf32>
    %10 = arith.addf %7, %9 : vector<1x128xf32>
    %c0_7 = arith.constant 0 : index
    %c0_8 = arith.constant 0 : index
    %11 = vector.load %arg8[%c0_7, %c0_8] : memref<1x128xf32, #tpu.memory_space<vmem>>, vector<1x128xf32>
    tpu.vector_store %arg8[%c0_7, %c0_8], %10 {strides = array<i32>} : memref<1x128xf32, #tpu.memory_space<vmem>>, vector<1x128xf32>,
    %c0_9 = arith.constant 0 : index
    %c0_10 = arith.constant 0 : index
    %12 = vector.load %arg9[%c0_9, %c0_10] : memref<1x128xf32, #tpu.memory_space<vmem>>, vector<1x128xf32>
    %13 = arith.mulf %6, %6 : vector<8x128xf32>
    %cst_11 = arith.constant dense<0.000000e+00> : vector<128xf32>
    %14 = vector.multi_reduction <add>, %13, %cst_11 [0] : vector<8x128xf32> to vector<128xf32>
    %15 = vector.shape_cast %14 : vector<128xf32> to vector<1x128xf32>
    %16 = arith.addf %12, %15 : vector<1x128xf32>
    %c0_12 = arith.constant 0 : index
    %c0_13 = arith.constant 0 : index
    %17 = vector.load %arg9[%c0_12, %c0_13] : memref<1x128xf32, #tpu.memory_space<vmem>>, vector<1x128xf32>
    tpu.vector_store %arg9[%c0_12, %c0_13], %16 {strides = array<i32>} : memref<1x128xf32, #tpu.memory_space<vmem>>, vector<1x128xf32>,
    %c8_i32 = arith.constant 8 : i32
    %18 = arith.muli %arg0, %c8_i32 : i32
    %19 = tpu.assume_multiple %18, 8 : i32
    %20 = arith.index_cast %19 : i32 to index
    %c0_14 = arith.constant 0 : index
    %21 = vector.load %arg10[%20, %c0_14] : memref<32x128xf32, #tpu.memory_space<vmem>>, vector<8x128xf32>
    tpu.vector_store %arg10[%20, %c0_14], %6 {strides = array<i32>} : memref<32x128xf32, #tpu.memory_space<vmem>>, vector<8x128xf32>,
    %c3_i32 = arith.constant 3 : i32
    %22 = arith.cmpi eq, %arg0, %c3_i32 : i32
    %23 = arith.extui %22 : i1 to i32
    %c0_i32_15 = arith.constant 0 : i32
    %24 = arith.cmpi ne, %23, %c0_i32_15 : i32
    scf.if %24 {
      %c0_16 = arith.constant 0 : index
      %c0_17 = arith.constant 0 : index
      %25 = vector.load %arg5[%c0_16, %c0_17] : memref<8x128xf32, #tpu.memory_space<vmem>>, vector<8x128xf32>
      %26 = vector.extract_strided_slice %25 {offsets = [0, 0], sizes = [1, 128], strides = [1, 1]} : vector<8x128xf32> to vector<1x128xf32>
      %27 = vector.extract_strided_slice %25 {offsets = [1, 0], sizes = [1, 128], strides = [1, 1]} : vector<8x128xf32> to vector<1x128xf32>
      %28 = vector.extract_strided_slice %25 {offsets = [2, 0], sizes = [1, 128], strides = [1, 1]} : vector<8x128xf32> to vector<1x128xf32>
      %29 = vector.extract_strided_slice %25 {offsets = [3, 0], sizes = [1, 128], strides = [1, 1]} : vector<8x128xf32> to vector<1x128xf32>
      %c0_18 = arith.constant 0 : index
      %c0_19 = arith.constant 0 : index
      %30 = vector.load %arg8[%c0_18, %c0_19] : memref<1x128xf32, #tpu.memory_space<vmem>>, vector<1x128xf32>
      %cst_20 = arith.constant 3.125000e-02 : f32
      %31 = vector.broadcast %cst_20 : f32 to vector<1x128xf32>
      %32 = arith.mulf %30, %31 : vector<1x128xf32>
      %c0_21 = arith.constant 0 : index
      %c0_22 = arith.constant 0 : index
      %33 = vector.load %arg9[%c0_21, %c0_22] : memref<1x128xf32, #tpu.memory_space<vmem>>, vector<1x128xf32>
      %cst_23 = arith.constant 3.125000e-02 : f32
      %34 = vector.broadcast %cst_23 : f32 to vector<1x128xf32>
      %35 = arith.mulf %33, %34 : vector<1x128xf32>
      %36 = arith.mulf %32, %32 : vector<1x128xf32>
      %37 = arith.subf %35, %36 : vector<1x128xf32>
      %cst_24 = arith.constant 0.000000e+00 : f32
      %38 = vector.broadcast %cst_24 : f32 to vector<1x128xf32>
      %39 = arith.maximumf %37, %38 : vector<1x128xf32>
      %cst_25 = arith.constant 9.99999974E-6 : f32
      %40 = vector.broadcast %cst_25 : f32 to vector<1x128xf32>
      %41 = arith.addf %39, %40 : vector<1x128xf32>
      %42 = math.rsqrt %41 : vector<1x128xf32>
      %43 = arith.mulf %26, %42 : vector<1x128xf32>
      %44 = arith.mulf %32, %43 : vector<1x128xf32>
      %45 = arith.subf %27, %44 : vector<1x128xf32>
      %c0_26 = arith.constant 0 : index
      %c0_27 = arith.constant 0 : index
      %46 = vector.load %arg10[%c0_26, %c0_27] : memref<32x128xf32, #tpu.memory_space<vmem>>, vector<32x128xf32>
      %47 = vector.broadcast %43 : vector<1x128xf32> to vector<32x128xf32>
      %48 = arith.mulf %46, %47 : vector<32x128xf32>
      %49 = vector.broadcast %45 : vector<1x128xf32> to vector<32x128xf32>
      %50 = arith.addf %48, %49 : vector<32x128xf32>
      %cst_28 = arith.constant 0.000000e+00 : f32
      %51 = vector.broadcast %cst_28 : f32 to vector<32x128xf32>
      %52 = arith.maximumf %50, %51 : vector<32x128xf32>
      %53 = arith.truncf %52 : vector<32x128xf32> to vector<32x128xbf16>
      %c0_29 = arith.constant 0 : index
      %c0_30 = arith.constant 0 : index
      %54 = vector.load %arg3[%c0_29, %c0_30] : memref<128x128xbf16, #tpu.memory_space<vmem>>, vector<128x128xbf16>
      %cst_31 = arith.constant dense<0.000000e+00> : vector<32x128xf32>
      %55 = tpu.matmul %53, %54, %cst_31 {dimension_numbers = #tpu.dot_dimension_numbers<[1], [0], [0], [1], [0, 0, 1, 1], [], []>} : vector<32x128xbf16>, vector<128x128xbf16>, vector<32x128xf32> -> vector<32x128xf32>
      %cst_32 = arith.constant dense<0.000000e+00> : vector<128xf32>
      %56 = vector.multi_reduction <add>, %55, %cst_32 [0] : vector<32x128xf32> to vector<128xf32>
      %57 = vector.shape_cast %56 : vector<128xf32> to vector<1x128xf32>
      %cst_33 = arith.constant 3.200000e+01 : f32
      %58 = vector.broadcast %cst_33 : f32 to vector<1x128xf32>
      %59 = arith.divf %57, %58 : vector<1x128xf32>
      %60 = arith.mulf %55, %55 : vector<32x128xf32>
      %cst_34 = arith.constant dense<0.000000e+00> : vector<128xf32>
      %61 = vector.multi_reduction <add>, %60, %cst_34 [0] : vector<32x128xf32> to vector<128xf32>
      %62 = vector.shape_cast %61 : vector<128xf32> to vector<1x128xf32>
      %cst_35 = arith.constant 3.200000e+01 : f32
      %63 = vector.broadcast %cst_35 : f32 to vector<1x128xf32>
      %64 = arith.divf %62, %63 : vector<1x128xf32>
      %65 = arith.mulf %59, %59 : vector<1x128xf32>
      %66 = arith.subf %64, %65 : vector<1x128xf32>
      %cst_36 = arith.constant 0.000000e+00 : f32
      %67 = vector.broadcast %cst_36 : f32 to vector<1x128xf32>
      %68 = arith.maximumf %66, %67 : vector<1x128xf32>
      %cst_37 = arith.constant 9.99999974E-6 : f32
      %69 = vector.broadcast %cst_37 : f32 to vector<1x128xf32>
      %70 = arith.addf %68, %69 : vector<1x128xf32>
      %71 = math.rsqrt %70 : vector<1x128xf32>
      %72 = arith.mulf %28, %71 : vector<1x128xf32>
      %73 = arith.mulf %59, %72 : vector<1x128xf32>
      %74 = arith.subf %29, %73 : vector<1x128xf32>
      %75 = vector.broadcast %72 : vector<1x128xf32> to vector<32x128xf32>
      %76 = arith.mulf %55, %75 : vector<32x128xf32>
      %77 = vector.broadcast %74 : vector<1x128xf32> to vector<32x128xf32>
      %78 = arith.addf %76, %77 : vector<32x128xf32>
      %cst_38 = arith.constant 0.000000e+00 : f32
      %79 = vector.broadcast %cst_38 : f32 to vector<32x128xf32>
      %80 = arith.maximumf %78, %79 : vector<32x128xf32>
      %81 = arith.truncf %80 : vector<32x128xf32> to vector<32x128xbf16>
      %c0_39 = arith.constant 0 : index
      %c0_40 = arith.constant 0 : index
      %82 = vector.load %arg4[%c0_39, %c0_40] : memref<128x8xbf16, #tpu.memory_space<vmem>>, vector<128x8xbf16>
      %cst_41 = arith.constant dense<0.000000e+00> : vector<32x8xf32>
      %83 = tpu.matmul %81, %82, %cst_41 {dimension_numbers = #tpu.dot_dimension_numbers<[1], [0], [0], [1], [0, 0, 1, 1], [], []>} : vector<32x128xbf16>, vector<128x8xbf16>, vector<32x8xf32> -> vector<32x8xf32>
      %c0_42 = arith.constant 0 : index
      %c0_43 = arith.constant 0 : index
      %84 = vector.load %arg6[%c0_42, %c0_43] : memref<1x8xf32, #tpu.memory_space<vmem>>, vector<1x8xf32>
      %85 = vector.broadcast %84 : vector<1x8xf32> to vector<32x8xf32>
      %86 = arith.addf %83, %85 : vector<32x8xf32>
      %87 = math.tanh %86 : vector<32x8xf32>
      %c0_44 = arith.constant 0 : index
      %c0_45 = arith.constant 0 : index
      %88 = vector.load %arg7[%c0_44, %c0_45] : memref<32x8xf32, #tpu.memory_space<vmem>>, vector<32x8xf32>
      tpu.vector_store %arg7[%c0_44, %c0_45], %87 {strides = array<i32>} : memref<32x8xf32, #tpu.memory_space<vmem>>, vector<32x8xf32>,
    } else {
    }
    return
  }
  func.func @transform_0(%arg0: i32) -> (i32, i32) {
    %c0_i32 = arith.constant 0 : i32
    %c0_i32_0 = arith.constant 0 : i32
    return %arg0, %c0_i32 : i32, i32
  }
  func.func @transform_1(%arg0: i32) -> (i32, i32) {
    %c0_i32 = arith.constant 0 : i32
    %c0_i32_0 = arith.constant 0 : i32
    %c0_i32_1 = arith.constant 0 : i32
    return %c0_i32, %c0_i32_0 : i32, i32
  }
  func.func @transform_2(%arg0: i32) -> (i32, i32) {
    %c0_i32 = arith.constant 0 : i32
    %c0_i32_0 = arith.constant 0 : i32
    %c0_i32_1 = arith.constant 0 : i32
    return %c0_i32, %c0_i32_0 : i32, i32
  }
  func.func @transform_3(%arg0: i32) -> (i32, i32) {
    %c0_i32 = arith.constant 0 : i32
    %c0_i32_0 = arith.constant 0 : i32
    %c0_i32_1 = arith.constant 0 : i32
    return %c0_i32, %c0_i32_0 : i32, i32
  }
  func.func @transform_4(%arg0: i32) -> (i32, i32) {
    %c0_i32 = arith.constant 0 : i32
    %c0_i32_0 = arith.constant 0 : i32
    %c0_i32_1 = arith.constant 0 : i32
    return %c0_i32, %c0_i32_0 : i32, i32
  }
  func.func @transform_5(%arg0: i32) -> (i32, i32) {
    %c0_i32 = arith.constant 0 : i32
    %c0_i32_0 = arith.constant 0 : i32
    %c0_i32_1 = arith.constant 0 : i32
    return %c0_i32, %c0_i32_0 : i32, i32
  }
  func.func @transform_6(%arg0: i32) -> (i32, i32) {
    %c0_i32 = arith.constant 0 : i32
    %c0_i32_0 = arith.constant 0 : i32
    %c0_i32_1 = arith.constant 0 : i32
    return %c0_i32, %c0_i32_0 : i32, i32
  }
}

</mosaic_0001>

<bundles_post_ra>
// kernel: fwd.1
= control target key start
LH: loop header
LB: loop body
LE: loop exit
PB: predicated region body
PF: predicated region fallthrough
CT: control target
= control target key end

     0   :  { %11 = vsyncpa [#allocation6], 0  ;;  %s1173_s0 = inlined_call_operand.vmem [shape: f32[32,16], index: 0, kind: input, shape index: {}]   ;;  %s1174_s1 = inlined_call_operand.vmem [shape: bf16[16,128], index: 1, kind: input, shape index: {}]   ;;  %s1175_s2 = inlined_call_operand.hbm [shape: bf16[128,128], index: 2, kind: input, shape index: {}]   ;;  %s1176_s3 = inlined_call_operand.vmem [shape: bf16[128,8], index: 3, kind: input, shape index: {}]   ;;  %s1177_s4 = inlined_call_operand.hbm [shape: f32[8,128], index: 4, kind: input, shape index: {}]   ;;  %s1178_s5 = inlined_call_operand.vmem [shape: f32[1,8], index: 5, kind: input, shape index: {}]   ;;  %s1179_s6 = inlined_call_operand.vmem [shape: f32[32,8], index: 6, kind: output, shape index: {}]  }
   0x1   :  { %12 = vsyncpa [#allocation8], 0  ;;  %s1024_s21 = smov 0  }
   0x2 LB: > { %s1030_s22 = sadd.s32 4294967295, %s980_s21   ;;  %p747_p0 = scmp.ge.s32.totalorder %s980_s21, 1  ;;  %s980_s21 = sphi %s1024_s21, %s18_s21  }
   0x3   : > { %p175_p1 = scmp.lt.s32.totalorder %s980_s21, 5  ;;  %s982_s23 = smov [#allocation5]  }
   0x4   : > { %s190_s24 = sshll.u32 %s982_s23, 4  ;;  %p1180_p4 = scmp.eq.s32.totalorder %s1030_s22, 0  ;;  %s191_s24 = int_to_ptr.vmem [resolvable:$true] %s190_s24 }
   0x5   : > { %p1035_p3 = pnand %p747_p0, %p175_p1  ;;  %s983_s26 = smov [#allocation7]  }
   0x6   : > { %s207_s27 = sshll.u32 %s983_s26, 4  ;;  %s910_s7 = scalar_lea.hbm %s1175_s2, 1024  ;;  %s1048_s27 = int_to_ptr.vmem [resolvable:$true] %s207_s27 }
   0x7   : > { %s1182_s25 = scalar_select %p1035_p3, 1, 0 }
   0x8   : > { %p855_p5 = pneg %p1035_p3  ;;  %p911_p7 = scmp.ne.s32.totalorder %s1175_s2, %s910_s7 }
   0x9   : > { %p917_p11 = scmp.lt.u32.totalorder %s910_s7, %s1175_s2 }
   0xa   : > { %p1044_p6 = pnand %p1180_p4, %p855_p5 }
   0xc   : > { %p912_p8 = pneg %p1044_p6 }
   0xe   : > { %p913_p9 = pnand %p912_p8, %p911_p7 }
  0x10   : > { %p914_p10 = pneg %p913_p9 }
  0x12   : > { %p919_p12 = pnand %p917_p11, %p914_p10 }
  0x14   : > { %922 = shalt.err (!%p919_p12)
}
  0x15   : > { %s923_s12 = scalar_lea.vmem %s191_s24, 1024  ;;  %p931_p5 = scmp.lt.s32.totalorder %s191_s24, %s191_s24 }
  0x16   : > { %p924_p13 = scmp.ne.s32.totalorder %s191_s24, %s923_s12  ;;  %p932_p2 = scmp.lt.s32.totalorder %s923_s12, %s923_s12 }
  0x18   : > { %p926_p0 = pnand %p924_p13, %p912_p8  ;;  %p933_p4 = por %p932_p2, %p931_p5 }
  0x1a   : > { %p927_p1 = pneg %p926_p0 }
  0x1c   : > { %p934_p3 = pnand %p933_p4, %p927_p1 }
  0x1e   : > { %937 = shalt.err (!%p934_p3)
}
  0x1f   : > { %s984_s13 = smov 64   ;;  %s985_s14 = smov 4  }
  0x20   : > { %858 = dma.hbm_to_vmem [thread:$0]  (!%p1044_p6), %s1175_s2, 1024, %s191_s24, [#allocation6], %s984_s13, %s984_s13, %s985_s14  }
  0x21   : > { %s938_s19 = scalar_lea.hbm %s1177_s4, 128 }
  0x22   : > { %p939_p7 = scmp.ne.s32.totalorder %s1177_s4, %s938_s19  ;;  %p945_p4 = scmp.lt.u32.totalorder %s938_s19, %s1177_s4 }
  0x24   : > { %p941_p2 = pnand %p939_p7, %p912_p8 }
  0x26   : > { %p942_p3 = pneg %p941_p2 }
  0x28   : > { %p947_p9 = pnand %p945_p4, %p942_p3 }
  0x2a   : > { %950 = shalt.err (!%p947_p9)
}
  0x2b   : > { %s951_s24 = scalar_lea.vmem %s1048_s27, 128  ;;  %p959_p13 = scmp.lt.s32.totalorder %s1048_s27, %s1048_s27 }
  0x2c   : > { %p952_p10 = scmp.ne.s32.totalorder %s1048_s27, %s951_s24  ;;  %p960_p0 = scmp.lt.s32.totalorder %s951_s24, %s951_s24 }
  0x2e   : > { %p954_p11 = pnand %p952_p10, %p912_p8  ;;  %p961_p1 = por %p960_p0, %p959_p13 }
  0x30   : > { %p955_p12 = pneg %p954_p11 }
  0x32   : > { %p962_p5 = pnand %p961_p1, %p955_p12 }
  0x34   : > { %965 = shalt.err (!%p962_p5)
}
  0x35   : > { %861 = dma.hbm_to_vmem [thread:$0]  (!%p1044_p6), %s1177_s4, 128, %s1048_s27, [#allocation8]  }
  0x36   : > { %p1184_p7 = scmp.ne.s32.totalorder %s1182_s25, 0 }
  0x37   : > { %p1185_p2 = scmp.eq.s32.totalorder (!%p1184_p7), %s1030_s22, 0 }
  0x38   : > { %230 = sbr.rel (%p1184_p7) target bundleno = 854 (0x356), region = 44 }
  0x3f   : > { %971 = dma.done.wait (%p1185_p2), [#allocation6], 1024   ;;  %p1186_p8 = pmov %p1185_p2 }
  0x40   : > { %p1187_p3 = pmov %p1185_p2 }
  0x41   : > { %973 = vsyncadd (%p1186_p8), [#allocation6], 4294966272 }
  0x42   : > { %975 = dma.done.wait (%p1187_p3), [#allocation8], 128   ;;  %p1188_p4 = pmov %p1185_p2 }
  0x43   : > { %p258_p9 = scmp.lt.s32.totalorder %s1030_s22, 3  ;;  %p1189_p6 = scmp.ne.s32.totalorder %s1030_s22, 0 }
  0x44   : > { %977 = vsyncadd (%p1188_p4), [#allocation8], 4294967168  ;;  %v986_v0 = vmov (!%p1189_p6), 0.0  }
  0x45   : > { %s259_s28 = scalar_select %p258_p9, %s1030_s22, 3 }
  0x46   : > { %266 = sbr.rel (%p1189_p6) target bundleno = 77 (0x4d), region = 56  ;;  %267 = vst [vmem:[#allocation2] sm:$0x1] (!%p1189_p6), %v986_v0  ;;  %268 = vst [vmem:[#allocation3] sm:$0x1] (!%p1189_p6), %v986_v0 }
  0x47   : > { %s754_s27 = sshll.u32 %s259_s28, 3 }
  0x48   : > { %s261_s9 = scalar_lea.vmem %s1173_s0, %s754_s27 }
  0x4d PF: > { %v881_v1 = vld [vmem:[%s1174_s1] sm:$0xff]   ;;  %v987_v2 = vmov 0.0   ;;  %vm988_vm0 = vmmov 0   ;;  %vm279_vm1 = vcmask 130048   ;;  %s758_s12 = sshll.u32 %s1030_s22, 3  ;;  %p759_p10 = scmp.ne.s32.totalorder %s1030_s22, 3 }
  0x4e   : > { %801 = vmatprep.subr.bf16.mxu0 %v987_v2  ;;  %v269_v3 = vld [vmem:[%s261_s9] sm:$0xff]  ;;  %803 = vmatprep.mubr.msk.bf16.mxu0 %vm988_vm0, %v987_v2  ;;  %s343_s13 = scalar_lea.vmem [#allocation4], %s758_s12  ;;  %v883_v27 = vld [vmem:[#allocation5 + $0x8] sm:$0xff] (!%p759_p10)   ;;  %v884_v28 = vld [vmem:[#allocation5 + $0x10] sm:$0xff] (!%p759_p10)   ;;  %v362_v41 = vlaneseq (!%p759_p10)  ;;  %vm689_vm2 = vcmask (!%p759_p10), 64512  }
  0x4f   : > { %802 = vmatpush3.bf16.msra.mxu0 %v881_v1  ;;  %v270_v4 = vpack.c.bf16 %v269_v3, %v269_v3  ;;  %v323_v19 = vld [vmem:[#allocation2] sm:$0x1]  ;;  %v332_v22 = vld [vmem:[#allocation3] sm:$0x1]  ;;  %v882_v26 = vld [vmem:[#allocation5] sm:$0xff] (!%p759_p10)  }
  0x50   : > { %807 = vmatprep.subr.bf16.mxu0 (!%p759_p10), %v882_v26  ;;  %v885_v29 = vld [vmem:[#allocation5 + $0x18] sm:$0xff] (!%p759_p10)   ;;  %v886_v34 = vld [vmem:[#allocation5 + $0x20] sm:$0xff] (!%p759_p10)   ;;  %v887_v38 = vld [vmem:[#allocation5 + $0x28] sm:$0xff] (!%p759_p10)   ;;  %v1119_v43 = vshrl.u32 (!%p759_p10), %v362_v41, 7 }
  0x51   : > { %v888_v40 = vld [vmem:[#allocation5 + $0x30] sm:$0xff] (!%p759_p10)   ;;  %v889_v42 = vld [vmem:[#allocation5 + $0x38] sm:$0xff] (!%p759_p10)   ;;  %v1121_v44 = vld [vmem:[#allocation7] sm:$0xff] (!%p759_p10) }
  0x52   : > { %804 = vmatmul.mubr.msk.bf16.vlgmr.msra.gmra.mrb[0].mxu0 %vm279_vm1, %v270_v4  ;;  %v364_v47 = vsub.s32 (!%p759_p10), 0, %v1119_v43  ;;  %v382_v55 = vsub.s32 (!%p759_p10), 1, %v1119_v43 }
  0x53   : > { %808 = vmatpush3.bf16.msra.mxu0 (!%p759_p10), %v882_v26 }
  0x54   : > { %809 = vmatprep.subr.bf16.mxu0 (!%p759_p10), %v883_v27 }
  0x57   : > { %810 = vmatpush3.bf16.msra.mxu0 (!%p759_p10), %v883_v27 }
  0x58   : > { %811 = vmatprep.subr.bf16.mxu0 (!%p759_p10), %v884_v28 }
  0x5b   : > { %812 = vmatpush3.bf16.msra.mxu0 (!%p759_p10), %v884_v28 }
  0x5c   : > { %813 = vmatprep.subr.bf16.mxu0 (!%p759_p10), %v885_v29 }
  0x5f   : > { %814 = vmatpush3.bf16.msra.mxu0 (!%p759_p10), %v885_v29 }
  0x60   : > { %815 = vmatprep.subr.bf16.mxu0 (!%p759_p10), %v886_v34 }
  0x63   : > { %816 = vmatpush3.bf16.msra.mxu0 (!%p759_p10), %v886_v34 }
  0x64   : > { %817 = vmatprep.subr.bf16.mxu0 (!%p759_p10), %v887_v38 }
  0x67   : > { %818 = vmatpush3.bf16.msra.mxu0 (!%p759_p10), %v887_v38 }
  0x68   : > { %819 = vmatprep.subr.bf16.mxu0 (!%p759_p10), %v888_v40 }
  0x6b   : > { %820 = vmatpush3.bf16.msra.mxu0 (!%p759_p10), %v888_v40 }
  0x6c   : > { %821 = vmatprep.subr.bf16.mxu0 (!%p759_p10), %v889_v42 }
  0x6f   : > { %822 = vmatpush3.bf16.msra.mxu0 (!%p759_p10), %v889_v42 }
 0x125   : > { %v317_v5 = vpop.f32.mrb[0].mxu0 }
 0x126   : > { %v324_v6 = vrot.slane %v317_v5, 4  ;;  %v333_v7 = vmul.f32 %v317_v5, %v317_v5  ;;  %344 = vst [vmem:[%s343_s13] sm:$0xff] %v317_v5  ;;  %v805_v8 = vpop.f32.mrb[1].mxu0 }
 0x127   : > { %v320_v9 = vpop.f32.mrb[2].mxu0  ;;  %v890_v8 = vld [vmem:[%s1176_s3] sm:$0xff] (!%p759_p10)  }
 0x128   : > { %v325_v10 = vadd.f32 %v324_v6, %v317_v5  ;;  %v334_v11 = vrot.slane %v333_v7, 4  ;;  %v806_v12 = vpop.f32.mrb[3].mxu0  ;;  %827 = vmatprep.subr.bf16.mxu1 (!%p759_p10), %v890_v8  ;;  %v891_v9 = vld [vmem:[%s1176_s3 + $0x8] sm:$0xff] (!%p759_p10)  }
 0x129   : > { %828 = vmatpush3.bf16.msra.mxu1 (!%p759_p10), %v890_v8  ;;  %v894_v12 = vld [vmem:[%s1176_s3 + $0x20] sm:$0xff] (!%p759_p10)  }
 0x12a   : > { %v326_v13 = vrot.slane %v325_v10, 2  ;;  %v335_v14 = vadd.f32 %v334_v11, %v333_v7  ;;  %829 = vmatprep.subr.bf16.mxu1 (!%p759_p10), %v891_v9  ;;  %v893_v11 = vld [vmem:[%s1176_s3 + $0x18] sm:$0xff] (!%p759_p10)  }
 0x12c   : > { %v327_v15 = vadd.f32 %v326_v13, %v325_v10  ;;  %v336_v16 = vrot.slane %v335_v14, 2  ;;  %v892_v10 = vld [vmem:[%s1176_s3 + $0x10] sm:$0xff] (!%p759_p10)   ;;  %v895_v13 = vld [vmem:[%s1176_s3 + $0x28] sm:$0xff] (!%p759_p10)  }
 0x12d   : > { %v368_v49 = vld [vmem:[#allocation4] sm:$0xff] (!%p759_p10)  ;;  %v369_v51 = vld [vmem:[#allocation4 + $0x8] sm:$0xff] (!%p759_p10)  ;;  %v370_v52 = vld [vmem:[#allocation4 + $0x10] sm:$0xff] (!%p759_p10)  ;;  %830 = vmatpush3.bf16.msra.mxu1 (!%p759_p10), %v891_v9 }
 0x12e   : > { %v328_v17 = vrot.slane %v327_v15, 1  ;;  %v337_v18 = vadd.f32 %v336_v16, %v335_v14  ;;  %v371_v53 = vld [vmem:[#allocation4 + $0x18] sm:$0xff] (!%p759_p10)  ;;  %831 = vmatprep.subr.bf16.mxu1 (!%p759_p10), %v892_v10  ;;  %v896_v14 = vld [vmem:[%s1176_s3 + $0x30] sm:$0xff] (!%p759_p10)  }
 0x130   : > { %v329_v20 = vadd.f32 %v328_v17, %v327_v15  ;;  %v338_v21 = vrot.slane %v337_v18, 1  ;;  %348 = sbr.rel (%p759_p10) target bundleno = 854 (0x356), region = 60  ;;  %v897_v15 = vld [vmem:[%s1176_s3 + $0x38] sm:$0xff] (!%p759_p10)  }
 0x131   : > { %832 = vmatpush3.bf16.msra.mxu1 (!%p759_p10), %v892_v10 }
 0x132   : > { %v330_v23 = vadd.f32 %v329_v20, %v323_v19  ;;  %v339_v24 = vadd.f32 %v338_v21, %v337_v18  ;;  %833 = vmatprep.subr.bf16.mxu1 (!%p759_p10), %v893_v11 }
 0x134   : > { %331 = vst [vmem:[#allocation2] sm:$0x1] %v330_v23  ;;  %v340_v25 = vadd.f32 %v339_v24, %v332_v22 }
 0x135   : > { %834 = vmatpush3.bf16.msra.mxu1 (!%p759_p10), %v893_v11 }
 0x136   : > { %341 = vst [vmem:[#allocation3] sm:$0x1] %v340_v25  ;;  %835 = vmatprep.subr.bf16.mxu1 (!%p759_p10), %v894_v12 }
 0x139   : > { %836 = vmatpush3.bf16.msra.mxu1 %v894_v12 }
 0x13a   : > { %837 = vmatprep.subr.bf16.mxu1 %v895_v13 }
 0x13b   : > { %v350_v30 = vld [vmem:[#allocation2] sm:$0x1] }
 0x13c   : > { %v351_v32 = vmul.f32 0.03125, %v350_v30 }
 0x13d   : > { %v352_v31 = vld [vmem:[#allocation3] sm:$0x1]  ;;  %838 = vmatpush3.bf16.msra.mxu1 %v895_v13 }
 0x13e   : > { %v353_v33 = vmul.f32 0.03125, %v352_v31  ;;  %v354_v35 = vmul.f32 %v351_v32, %v351_v32  ;;  %839 = vmatprep.subr.bf16.mxu1 %v896_v14 }
 0x140   : > { %v355_v36 = vsub.f32 %v353_v33, %v354_v35 }
 0x141   : > { %840 = vmatpush3.bf16.msra.mxu1 %v896_v14 }
 0x142   : > { %v356_v37 = vmax.f32 %v355_v36, 0.0  ;;  %841 = vmatprep.subr.bf16.mxu1 %v897_v15 }
 0x144   : > { %v357_v39 = vadd.f32 1e-05, %v356_v37 }
 0x145   : > { %842 = vmatpush3.bf16.msra.mxu1 %v897_v15 }
 0x146   : > { %898 = vrsqrt.f32 %v357_v39 }
 0x150   : > { %v899_v45 = vpop.eup %898 }
 0x151   : > { %v359_v46 = vmul.f32 %v899_v45, %v1121_v44 }
 0x153   : > { %v360_v48 = vmul.f32 %v359_v46, %v351_v32  ;;  %v375_v50 = vrot.slane %v359_v46, %v364_v47 }
 0x155   : > { %v365_v54 = vrot.slane %v360_v48, %v364_v47  ;;  %v376_v56 = vmul.f32 %v375_v50, %v368_v49  ;;  %v377_v58 = vmul.f32 %v375_v50, %v369_v51  ;;  %v378_v59 = vmul.f32 %v375_v50, %v370_v52 }
 0x156   : > { %v379_v60 = vmul.f32 %v375_v50, %v371_v53  ;;  %v545_v50 = vsub.s32 2, %v1119_v43 }
 0x157   : > { %v367_v57 = vsub.f32 %v1121_v44, %v365_v54 }
 0x159   : > { %v383_v61 = vrot.slane %v367_v57, %v382_v55  ;;  %v553_v55 = vsub.s32 3, %v1119_v43  ;;  %v768_v43 = vld [vmem:[%s1178_s5] ss:$0 sm:$0xff] }
 0x15b   : > { %v384_v62 = vadd.f32 %v383_v61, %v376_v56  ;;  %v385_v63 = vadd.f32 %v383_v61, %v377_v58  ;;  %v386_v0 = vadd.f32 %v383_v61, %v378_v59  ;;  %v387_v1 = vadd.f32 %v383_v61, %v379_v60 }
 0x15d   : > { %v388_v2 = vmax.f32 %v384_v62, 0.0  ;;  %v389_v3 = vmax.f32 %v385_v63, 0.0  ;;  %v390_v4 = vmax.f32 %v386_v0, 0.0  ;;  %v391_v5 = vmax.f32 %v387_v1, 0.0 }
 0x15f   : > { %v392_v6 = vpack.c.bf16 %v389_v3, %v388_v2  ;;  %v393_v7 = vpack.c.bf16 %v391_v5, %v390_v4 }
 0x161   : > { %823 = vmatprep.mubr.bf16.mxu0 %v392_v6 }
 0x162   : > { %824 = vmatmul.mubr.bf16.vlgmr.msra.gmra.mrb[0].mxu0 %v393_v7 }
 0x235   : > { %v825_v16 = vpop.f32.mrb[0].mxu0 }
 0x236   : > { %v492_v17 = vpop.f32.mrb[1].mxu0  ;;  %v520_v23 = vmul.f32 %v825_v16, %v825_v16 }
 0x237   : > { %v826_v18 = vpop.f32.mrb[2].mxu0  ;;  %v518_v20 = vmul.f32 %v492_v17, %v492_v17 }
 0x238   : > { %v495_v19 = vpop.f32.mrb[3].mxu0  ;;  %v521_v26 = vmul.f32 %v826_v18, %v826_v18 }
 0x239   : > { %v507_v21 = vadd.f32 %v495_v19, %v492_v17  ;;  %v519_v22 = vmul.f32 %v495_v19, %v495_v19 }
 0x23b   : > { %v508_v24 = vadd.f32 %v825_v16, %v507_v21  ;;  %v522_v25 = vadd.f32 %v519_v22, %v518_v20 }
 0x23d   : > { %v509_v27 = vadd.f32 %v826_v18, %v508_v24  ;;  %v523_v28 = vadd.f32 %v522_v25, %v520_v23 }
 0x23f   : > { %v510_v29 = vrot.slane %v509_v27, 4  ;;  %v524_v30 = vadd.f32 %v523_v28, %v521_v26 }
 0x241   : > { %v511_v31 = vadd.f32 %v510_v29, %v509_v27  ;;  %v525_v32 = vrot.slane %v524_v30, 4 }
 0x243   : > { %v512_v33 = vrot.slane %v511_v31, 2  ;;  %v526_v34 = vadd.f32 %v525_v32, %v524_v30 }
 0x245   : > { %v513_v35 = vadd.f32 %v512_v33, %v511_v31  ;;  %v527_v36 = vrot.slane %v526_v34, 2 }
 0x247   : > { %v514_v37 = vrot.slane %v513_v35, 1  ;;  %v528_v38 = vadd.f32 %v527_v36, %v526_v34 }
 0x249   : > { %v515_v39 = vadd.f32 %v514_v37, %v513_v35  ;;  %v529_v40 = vrot.slane %v528_v38, 1 }
 0x24b   : > { %v517_v41 = vmul.f32 0.03125, %v515_v39  ;;  %v530_v42 = vadd.f32 %v529_v40, %v528_v38 }
 0x24d   : > { %v531_v45 = vmul.f32 0.03125, %v530_v42  ;;  %v532_v46 = vmul.f32 %v517_v41, %v517_v41 }
 0x24f   : > { %v533_v47 = vsub.f32 %v531_v45, %v532_v46 }
 0x251   : > { %v534_v48 = vmax.f32 %v533_v47, 0.0 }
 0x253   : > { %v535_v49 = vadd.f32 1e-05, %v534_v48 }
 0x255   : > { %900 = vrsqrt.f32 %v535_v49 }
 0x25f   : > { %v901_v51 = vpop.eup %900 }
 0x260   : > { %v537_v52 = vmul.f32 %v901_v51, %v1121_v44 }
 0x262   : > { %v538_v53 = vmul.f32 %v537_v52, %v517_v41  ;;  %v546_v54 = vrot.slane %v537_v52, %v545_v50 }
 0x264   : > { %v540_v56 = vrot.slane %v538_v53, 7  ;;  %v548_v57 = vmul.f32 %v546_v54, %v495_v19  ;;  %v547_v58 = vmul.f32 %v546_v54, %v492_v17  ;;  %v549_v59 = vmul.f32 %v825_v16, %v546_v54 }
 0x265   : > { %v550_v60 = vmul.f32 %v826_v18, %v546_v54 }
 0x266   : > { %v542_v61 = vsub.f32 %v1121_v44, %v540_v56 }
 0x268   : > { %v554_v62 = vrot.slane %v542_v61, %v553_v55 }
 0x26a   : > { %v555_v63 = vadd.f32 %v554_v62, %v547_v58  ;;  %v556_v0 = vadd.f32 %v554_v62, %v548_v57  ;;  %v557_v1 = vadd.f32 %v554_v62, %v549_v59  ;;  %v558_v2 = vadd.f32 %v554_v62, %v550_v60 }
 0x26c   : > { %v559_v3 = vmax.f32 %v555_v63, 0.0  ;;  %v560_v4 = vmax.f32 %v556_v0, 0.0  ;;  %v561_v5 = vmax.f32 %v557_v1, 0.0  ;;  %v562_v6 = vmax.f32 %v558_v2, 0.0 }
 0x26e   : > { %v563_v7 = vpack.c.bf16 %v560_v4, %v559_v3  ;;  %v564_v8 = vpack.c.bf16 %v562_v6, %v561_v5 }
 0x270   : > { %843 = vmatprep.mubr.bf16.mxu1 %v563_v7 }
 0x271   : > { %844 = vmatmul.mubr.bf16.vlgmr.msra.gmra.mrb[0].mxu1 %v564_v8 }
 0x344   : > { %v845_v9 = vpop.f32.mrb[0].mxu1 }
 0x345   : > { %v679_v10 = vadd.f32 %v845_v9, %v768_v43  ;;  %v670_v44 = vpop.f32.mrb[1].mxu1 }
 0x346   : > { %v671_v11 = vadd.f32 %v768_v43, %v670_v44  ;;  %v846_v12 = vpop.f32.mrb[2].mxu1 }
 0x347   : > { %902 = vtanh.f32 %v679_v10  ;;  %v682_v13 = vadd.f32 %v846_v12, %v768_v43  ;;  %v673_v14 = vpop.f32.mrb[3].mxu1 }
 0x348   : > { %904 = vtanh.f32 %v671_v11  ;;  %v674_v15 = vadd.f32 %v768_v43, %v673_v14 }
 0x349   : > { %906 = vtanh.f32 %v682_v13 }
 0x34a   : > { %908 = vtanh.f32 %v674_v15 }
 0x351   : > { %v903_v16 = vpop.eup %902 }
 0x352   : > { %v905_v17 = vpop.eup %904  ;;  %692 = vst.msk [vmem:[%s1179_s6 + $0x10] sm:$0xff] %vm689_vm2, %v903_v16 }
 0x353   : > { %v907_v18 = vpop.eup %906  ;;  %690 = vst.msk [vmem:[%s1179_s6] sm:$0xff] %vm689_vm2, %v905_v17 }
 0x354   : > { %v909_v19 = vpop.eup %908  ;;  %693 = vst.msk [vmem:[%s1179_s6 + $0x18] sm:$0xff] %vm689_vm2, %v907_v18 }
 0x355   : > { %691 = vst.msk [vmem:[%s1179_s6 + $0x8] sm:$0xff] %vm689_vm2, %v909_v19 }
 0x356 PF: > { %s18_s21 = sadd.s32 1, %s980_s21  }
 0x357   : > { %p15_p11 = scmp.ge.s32.totalorder %s18_s21, 6  }
 0x359   :  { %17 = sbr.rel (!%p15_p11) target bundleno = 2 (0x2), region = 88 }
 0x360   :  { %705 = vsyncpa [#allocation6], 1 }
 0x361   :  { %707 = vsyncpa [#allocation6 + $0x1], 1 }
 0x362   :  { %708 = vsyncpa [#allocation8], 1 }

</bundles_post_ra>
